<compile_context>
chip_gen: v7x
topology: tpu7x:2x2x1
jax: 0.10.0
libtpu: 0.0.40
codegen_flags: <defaults>
</compile_context>

<pallas_src>
import jax
import jax.numpy as jnp
from jax.experimental import pallas as pl
from jax.experimental.pallas import tpu as pltpu

# ---------------------------------------------------------------- config ----
B, C, H, W = 2, 4, 16, 16          # input (NCHW, PyTorch convention)
P = 4                              # patch size (conv kernel = stride = P)
HP, WP = H // P, W // P
N = HP * WP                        # 16 patches
PATCH_DIM = C * P * P              # 64
DF = 32                            # conv out channels
FEAT_DIM = DF * N                  # 512 (PyTorch Flatten of (B, DF, Hp, Wp) — channel-major)
E = 64                             # embedding dim
NUM_CLASSES = 10
OUT_PAD = 128                      # lane-dense fused head width: [emb(64) | logits(10) | zeros]


# ---------------------------------------------------------------- kernel ----
def _fused_kernel(p_ref, wf_ref, bf_ref, wcat_ref, bcat_ref, out_ref, h_scr):
    # p_ref    : (N*B, PATCH_DIM)  im2col patches, rows n-major (row = n*B + b)
    # wf_ref   : (PATCH_DIM, DF)   conv weight (single copy, no per-patch broadcast)
    # bf_ref   : (1, DF)
    # wcat_ref : (N, DF, OUT_PAD)  per-patch [embedding | folded classifier] head blocks
    # bcat_ref : (1, OUT_PAD)
    # out_ref  : (B, OUT_PAD)      lane-dense fused head output
    # h_scr    : (N*B, DF)         VMEM scratch for the ReLU activations

    # "features": Conv2d(kernel=stride=P) + ReLU as ONE full-size matmul.
    h = jnp.dot(p_ref[...], wf_ref[...], preferred_element_type=jnp.float32)
    h_scr[...] = jnp.maximum(h + bf_ref[...], 0.0)

    # "embedding_layer" + folded "classifier_layer": single concatenated 128-wide head.
    # Contraction over (patch, channel): per-patch (B, DF) @ (DF, OUT_PAD), reduced over patches.
    acc = jnp.zeros((B, OUT_PAD), jnp.float32)
    for n in range(N):                                     # static unroll, N = 16
        h_n = h_scr[pl.ds(n * B, B), :]                    # (B, DF) rows of patch n
        acc = acc + jnp.dot(h_n, wcat_ref[n], preferred_element_type=jnp.float32)
    out_ref[...] = acc + bcat_ref[...]


# -------------------------------------------------------------- wrappers ----
def _full_spec(shape):
    # full-array block (tiling rule satisfied via the "equals full dims" exception)
    return pl.BlockSpec(shape, lambda: (0,) * len(shape))


def _fused_pallas(p2, wf, bf, wcat, bcat):
    return pl.pallas_call(
        _fused_kernel,
        out_shape=jax.ShapeDtypeStruct((B, OUT_PAD), jnp.float32),
        grid=(),
        in_specs=[_full_spec(a.shape) for a in (p2, wf, bf, wcat, bcat)],
        out_specs=_full_spec((B, OUT_PAD)),
        scratch_shapes=[pltpu.VMEM((N * B, DF), jnp.float32)],
    )(p2, wf, bf, wcat, bcat)


def patchify_nchw(x):
    # NCHW [B,C,H,W] -> [N*B, C*P*P]: the exact im2col a Conv2d(kernel=P, stride=P) sees,
    # rows n-major (row = n*B + b), features in (c, i, j) order. One XLA transpose.
    b = x.shape[0]
    x = x.reshape(b, C, HP, P, WP, P)
    x = jnp.transpose(x, (2, 4, 0, 1, 3, 5))          # (Hp, Wp, B, C, P, P)
    return x.reshape(N * b, PATCH_DIM)


def prepare_kernel_params(pt_params):
    """One-time conversion from PyTorch-layout params to kernel-layout params."""
    wf_pt, bf, we_pt, be, wc_pt, bc = pt_params
    # conv weight (DF, C, P, P) -> (PATCH_DIM, DF), rows in (c, i, j) order — single copy.
    wf = jnp.transpose(wf_pt.reshape(DF, PATCH_DIM))                  # (PATCH_DIM, DF)
    # PyTorch Flatten of (B, DF, Hp, Wp) is channel-major: feat[:, d*N + n].
    we = jnp.transpose(we_pt)                                         # (FEAT_DIM, E), rows (d, n)
    we3 = jnp.transpose(we.reshape(DF, N, E), (1, 0, 2))              # (N, DF, E)
    wc = jnp.transpose(wc_pt)                                         # (E, NUM_CLASSES)
    # fold the classifier through the embedding, then concat into one lane-dense head
    wl3 = jnp.einsum('nde,ec->ndc', we3, wc)                          # (N, DF, NUM_CLASSES)
    wcat = jnp.concatenate(
        [we3, wl3, jnp.zeros((N, DF, OUT_PAD - E - NUM_CLASSES), jnp.float32)], axis=-1)
    bl = be.reshape(1, E) @ wc + bc.reshape(1, NUM_CLASSES)
    bcat = jnp.concatenate(
        [be.reshape(1, E), bl, jnp.zeros((1, OUT_PAD - E - NUM_CLASSES), jnp.float32)], axis=-1)
    return (wf, bf.reshape(1, DF), wcat, bcat)


@jax.jit
def custom_model_apply(x, kparams):
    wf, bf, wcat, bcat = kparams
    p2 = patchify_nchw(x)
    out = _fused_pallas(p2, wf, bf, wcat, bcat)
    return out[:, :E], out[:, E:E + NUM_CLASSES]


def custom_model_forward(x, kparams):        # == CustomModel.forward
    return custom_model_apply(x, kparams)[1]


def custom_model_get_embedding(x, kparams):  # == CustomModel.get_embedding
    return custom_model_apply(x, kparams)[0]


# ------------------------------------------------------------- reference ----
def reference_forward(x, pt_params):
    # Pure-JAX reference with exact PyTorch semantics: Conv2d -> ReLU -> Flatten -> Linear -> Linear.
    wf_pt, bf, we_pt, be, wc_pt, bc = pt_params
    b = x.shape[0]
    xp = x.reshape(b, C, HP, P, WP, P)
    xp = jnp.transpose(xp, (0, 2, 4, 1, 3, 5)).reshape(b, N, PATCH_DIM)
    conv = jnp.maximum(jnp.einsum('bnp,dp->bnd', xp, wf_pt.reshape(DF, PATCH_DIM)) + bf, 0.0)
    feat = jnp.transpose(conv, (0, 2, 1)).reshape(b, FEAT_DIM)        # channel-major Flatten
    emb = feat @ jnp.transpose(we_pt) + be
    logits = emb @ jnp.transpose(wc_pt) + bc
    return emb, logits


# ------------------------------------------------------------------ main ----
if __name__ == "__main__":
    key = jax.random.PRNGKey(0)
    kx, k1, k2, k3 = jax.random.split(key, 4)

    x = jax.random.normal(kx, (B, C, H, W), dtype=jnp.float32)

    # deterministic synthetic params in PyTorch layouts (out_features leading)
    wf_pt = jax.random.normal(k1, (DF, C, P, P), dtype=jnp.float32) * 0.05
    bf = jnp.zeros((DF,), dtype=jnp.float32)
    we_pt = jax.random.normal(k2, (E, FEAT_DIM), dtype=jnp.float32) * 0.05
    be = jnp.full((E,), 0.01, dtype=jnp.float32)
    wc_pt = jax.random.normal(k3, (NUM_CLASSES, E), dtype=jnp.float32) * 0.05
    bc = jnp.full((NUM_CLASSES,), -0.01, dtype=jnp.float32)
    pt_params = (wf_pt, bf, we_pt, be, wc_pt, bc)

    kparams = prepare_kernel_params(pt_params)

    logits = custom_model_forward(x, kparams)
    emb = custom_model_get_embedding(x, kparams)
    jax.block_until_ready((emb, logits))

    emb_ref, logits_ref = reference_forward(x, pt_params)
    assert logits.shape == (B, NUM_CLASSES)
    assert emb.shape == (B, E)
    assert jnp.allclose(emb, emb_ref, atol=1e-4, rtol=1e-4)
    assert jnp.allclose(logits, logits_ref, atol=1e-4, rtol=1e-4)

    print("KERNEL_OK")
</pallas_src>

<mosaic_0001>
module attributes {stable_mosaic.version = 11 : i64} {
  func.func @_fused_kernel(%arg0: memref<32x64xf32, #tpu.memory_space<vmem>>, %arg1: memref<64x32xf32, #tpu.memory_space<vmem>>, %arg2: memref<1x32xf32, #tpu.memory_space<vmem>>, %arg3: memref<16x32x128xf32, #tpu.memory_space<vmem>>, %arg4: memref<1x128xf32, #tpu.memory_space<vmem>>, %arg5: memref<2x128xf32, #tpu.memory_space<vmem>>, %arg6: memref<32x32xf32, #tpu.memory_space<vmem>>) attributes {dimension_semantics = [], scalar_prefetch = 0 : i64, scratch_operands = 1 : i64, tpu.core_type = #tpu.core_type<tc>} {
    %c0 = arith.constant 0 : index
    %c0_0 = arith.constant 0 : index
    %0 = vector.load %arg0[%c0, %c0_0] : memref<32x64xf32, #tpu.memory_space<vmem>>, vector<32x64xf32>
    %c0_1 = arith.constant 0 : index
    %c0_2 = arith.constant 0 : index
    %1 = vector.load %arg1[%c0_1, %c0_2] : memref<64x32xf32, #tpu.memory_space<vmem>>, vector<64x32xf32>
    %cst = arith.constant dense<0.000000e+00> : vector<32x32xf32>
    %2 = tpu.matmul %0, %1, %cst {dimension_numbers = #tpu.dot_dimension_numbers<[1], [0], [0], [1], [0, 0, 1, 1], [], []>} : vector<32x64xf32>, vector<64x32xf32>, vector<32x32xf32> -> vector<32x32xf32>
    %c0_3 = arith.constant 0 : index
    %c0_4 = arith.constant 0 : index
    %3 = vector.load %arg2[%c0_3, %c0_4] : memref<1x32xf32, #tpu.memory_space<vmem>>, vector<1x32xf32>
    %4 = vector.broadcast %3 : vector<1x32xf32> to vector<32x32xf32>
    %5 = arith.addf %2, %4 : vector<32x32xf32>
    %cst_5 = arith.constant 0.000000e+00 : f32
    %6 = vector.broadcast %cst_5 : f32 to vector<32x32xf32>
    %7 = arith.maximumf %5, %6 : vector<32x32xf32>
    %c0_6 = arith.constant 0 : index
    %c0_7 = arith.constant 0 : index
    %8 = vector.load %arg6[%c0_6, %c0_7] : memref<32x32xf32, #tpu.memory_space<vmem>>, vector<32x32xf32>
    tpu.vector_store %arg6[%c0_6, %c0_7], %7 {strides = array<i32>} : memref<32x32xf32, #tpu.memory_space<vmem>>, vector<32x32xf32>,
    %cst_8 = arith.constant 0.000000e+00 : f32
    %9 = vector.broadcast %cst_8 : f32 to vector<2x128xf32>
    %c0_9 = arith.constant 0 : index
    %c0_10 = arith.constant 0 : index
    %10 = vector.load %arg6[%c0_9, %c0_10] : memref<32x32xf32, #tpu.memory_space<vmem>>, vector<2x32xf32>
    %c0_11 = arith.constant 0 : index
    %c0_12 = arith.constant 0 : index
    %c0_13 = arith.constant 0 : index
    %11 = vector.load %arg3[%c0_11, %c0_12, %c0_13] : memref<16x32x128xf32, #tpu.memory_space<vmem>>, vector<1x32x128xf32>
    %12 = vector.shape_cast %11 : vector<1x32x128xf32> to vector<32x128xf32>
    %cst_14 = arith.constant dense<0.000000e+00> : vector<2x128xf32>
    %13 = tpu.matmul %10, %12, %cst_14 {dimension_numbers = #tpu.dot_dimension_numbers<[1], [0], [0], [1], [0, 0, 1, 1], [], []>} : vector<2x32xf32>, vector<32x128xf32>, vector<2x128xf32> -> vector<2x128xf32>
    %14 = arith.addf %9, %13 : vector<2x128xf32>
    %c2 = arith.constant 2 : index
    %c0_15 = arith.constant 0 : index
    %15 = vector.load %arg6[%c2, %c0_15] : memref<32x32xf32, #tpu.memory_space<vmem>>, vector<2x32xf32>
    %c1 = arith.constant 1 : index
    %c0_16 = arith.constant 0 : index
    %c0_17 = arith.constant 0 : index
    %16 = vector.load %arg3[%c1, %c0_16, %c0_17] : memref<16x32x128xf32, #tpu.memory_space<vmem>>, vector<1x32x128xf32>
    %17 = vector.shape_cast %16 : vector<1x32x128xf32> to vector<32x128xf32>
    %cst_18 = arith.constant dense<0.000000e+00> : vector<2x128xf32>
    %18 = tpu.matmul %15, %17, %cst_18 {dimension_numbers = #tpu.dot_dimension_numbers<[1], [0], [0], [1], [0, 0, 1, 1], [], []>} : vector<2x32xf32>, vector<32x128xf32>, vector<2x128xf32> -> vector<2x128xf32>
    %19 = arith.addf %14, %18 : vector<2x128xf32>
    %c4 = arith.constant 4 : index
    %c0_19 = arith.constant 0 : index
    %20 = vector.load %arg6[%c4, %c0_19] : memref<32x32xf32, #tpu.memory_space<vmem>>, vector<2x32xf32>
    %c2_20 = arith.constant 2 : index
    %c0_21 = arith.constant 0 : index
    %c0_22 = arith.constant 0 : index
    %21 = vector.load %arg3[%c2_20, %c0_21, %c0_22] : memref<16x32x128xf32, #tpu.memory_space<vmem>>, vector<1x32x128xf32>
    %22 = vector.shape_cast %21 : vector<1x32x128xf32> to vector<32x128xf32>
    %cst_23 = arith.constant dense<0.000000e+00> : vector<2x128xf32>
    %23 = tpu.matmul %20, %22, %cst_23 {dimension_numbers = #tpu.dot_dimension_numbers<[1], [0], [0], [1], [0, 0, 1, 1], [], []>} : vector<2x32xf32>, vector<32x128xf32>, vector<2x128xf32> -> vector<2x128xf32>
    %24 = arith.addf %19, %23 : vector<2x128xf32>
    %c6 = arith.constant 6 : index
    %c0_24 = arith.constant 0 : index
    %25 = vector.load %arg6[%c6, %c0_24] : memref<32x32xf32, #tpu.memory_space<vmem>>, vector<2x32xf32>
    %c3 = arith.constant 3 : index
    %c0_25 = arith.constant 0 : index
    %c0_26 = arith.constant 0 : index
    %26 = vector.load %arg3[%c3, %c0_25, %c0_26] : memref<16x32x128xf32, #tpu.memory_space<vmem>>, vector<1x32x128xf32>
    %27 = vector.shape_cast %26 : vector<1x32x128xf32> to vector<32x128xf32>
    %cst_27 = arith.constant dense<0.000000e+00> : vector<2x128xf32>
    %28 = tpu.matmul %25, %27, %cst_27 {dimension_numbers = #tpu.dot_dimension_numbers<[1], [0], [0], [1], [0, 0, 1, 1], [], []>} : vector<2x32xf32>, vector<32x128xf32>, vector<2x128xf32> -> vector<2x128xf32>
    %29 = arith.addf %24, %28 : vector<2x128xf32>
    %c8 = arith.constant 8 : index
    %c0_28 = arith.constant 0 : index
    %30 = vector.load %arg6[%c8, %c0_28] : memref<32x32xf32, #tpu.memory_space<vmem>>, vector<2x32xf32>
    %c4_29 = arith.constant 4 : index
    %c0_30 = arith.constant 0 : index
    %c0_31 = arith.constant 0 : index
    %31 = vector.load %arg3[%c4_29, %c0_30, %c0_31] : memref<16x32x128xf32, #tpu.memory_space<vmem>>, vector<1x32x128xf32>
    %32 = vector.shape_cast %31 : vector<1x32x128xf32> to vector<32x128xf32>
    %cst_32 = arith.constant dense<0.000000e+00> : vector<2x128xf32>
    %33 = tpu.matmul %30, %32, %cst_32 {dimension_numbers = #tpu.dot_dimension_numbers<[1], [0], [0], [1], [0, 0, 1, 1], [], []>} : vector<2x32xf32>, vector<32x128xf32>, vector<2x128xf32> -> vector<2x128xf32>
    %34 = arith.addf %29, %33 : vector<2x128xf32>
    %c10 = arith.constant 10 : index
    %c0_33 = arith.constant 0 : index
    %35 = vector.load %arg6[%c10, %c0_33] : memref<32x32xf32, #tpu.memory_space<vmem>>, vector<2x32xf32>
    %c5 = arith.constant 5 : index
    %c0_34 = arith.constant 0 : index
    %c0_35 = arith.constant 0 : index
    %36 = vector.load %arg3[%c5, %c0_34, %c0_35] : memref<16x32x128xf32, #tpu.memory_space<vmem>>, vector<1x32x128xf32>
    %37 = vector.shape_cast %36 : vector<1x32x128xf32> to vector<32x128xf32>
    %cst_36 = arith.constant dense<0.000000e+00> : vector<2x128xf32>
    %38 = tpu.matmul %35, %37, %cst_36 {dimension_numbers = #tpu.dot_dimension_numbers<[1], [0], [0], [1], [0, 0, 1, 1], [], []>} : vector<2x32xf32>, vector<32x128xf32>, vector<2x128xf32> -> vector<2x128xf32>
    %39 = arith.addf %34, %38 : vector<2x128xf32>
    %c12 = arith.constant 12 : index
    %c0_37 = arith.constant 0 : index
    %40 = vector.load %arg6[%c12, %c0_37] : memref<32x32xf32, #tpu.memory_space<vmem>>, vector<2x32xf32>
    %c6_38 = arith.constant 6 : index
    %c0_39 = arith.constant 0 : index
    %c0_40 = arith.constant 0 : index
    %41 = vector.load %arg3[%c6_38, %c0_39, %c0_40] : memref<16x32x128xf32, #tpu.memory_space<vmem>>, vector<1x32x128xf32>
    %42 = vector.shape_cast %41 : vector<1x32x128xf32> to vector<32x128xf32>
    %cst_41 = arith.constant dense<0.000000e+00> : vector<2x128xf32>
    %43 = tpu.matmul %40, %42, %cst_41 {dimension_numbers = #tpu.dot_dimension_numbers<[1], [0], [0], [1], [0, 0, 1, 1], [], []>} : vector<2x32xf32>, vector<32x128xf32>, vector<2x128xf32> -> vector<2x128xf32>
    %44 = arith.addf %39, %43 : vector<2x128xf32>
    %c14 = arith.constant 14 : index
    %c0_42 = arith.constant 0 : index
    %45 = vector.load %arg6[%c14, %c0_42] : memref<32x32xf32, #tpu.memory_space<vmem>>, vector<2x32xf32>
    %c7 = arith.constant 7 : index
    %c0_43 = arith.constant 0 : index
    %c0_44 = arith.constant 0 : index
    %46 = vector.load %arg3[%c7, %c0_43, %c0_44] : memref<16x32x128xf32, #tpu.memory_space<vmem>>, vector<1x32x128xf32>
    %47 = vector.shape_cast %46 : vector<1x32x128xf32> to vector<32x128xf32>
    %cst_45 = arith.constant dense<0.000000e+00> : vector<2x128xf32>
    %48 = tpu.matmul %45, %47, %cst_45 {dimension_numbers = #tpu.dot_dimension_numbers<[1], [0], [0], [1], [0, 0, 1, 1], [], []>} : vector<2x32xf32>, vector<32x128xf32>, vector<2x128xf32> -> vector<2x128xf32>
    %49 = arith.addf %44, %48 : vector<2x128xf32>
    %c16 = arith.constant 16 : index
    %c0_46 = arith.constant 0 : index
    %50 = vector.load %arg6[%c16, %c0_46] : memref<32x32xf32, #tpu.memory_space<vmem>>, vector<2x32xf32>
    %c8_47 = arith.constant 8 : index
    %c0_48 = arith.constant 0 : index
    %c0_49 = arith.constant 0 : index
    %51 = vector.load %arg3[%c8_47, %c0_48, %c0_49] : memref<16x32x128xf32, #tpu.memory_space<vmem>>, vector<1x32x128xf32>
    %52 = vector.shape_cast %51 : vector<1x32x128xf32> to vector<32x128xf32>
    %cst_50 = arith.constant dense<0.000000e+00> : vector<2x128xf32>
    %53 = tpu.matmul %50, %52, %cst_50 {dimension_numbers = #tpu.dot_dimension_numbers<[1], [0], [0], [1], [0, 0, 1, 1], [], []>} : vector<2x32xf32>, vector<32x128xf32>, vector<2x128xf32> -> vector<2x128xf32>
    %54 = arith.addf %49, %53 : vector<2x128xf32>
    %c18 = arith.constant 18 : index
    %c0_51 = arith.constant 0 : index
    %55 = vector.load %arg6[%c18, %c0_51] : memref<32x32xf32, #tpu.memory_space<vmem>>, vector<2x32xf32>
    %c9 = arith.constant 9 : index
    %c0_52 = arith.constant 0 : index
    %c0_53 = arith.constant 0 : index
    %56 = vector.load %arg3[%c9, %c0_52, %c0_53] : memref<16x32x128xf32, #tpu.memory_space<vmem>>, vector<1x32x128xf32>
    %57 = vector.shape_cast %56 : vector<1x32x128xf32> to vector<32x128xf32>
    %cst_54 = arith.constant dense<0.000000e+00> : vector<2x128xf32>
    %58 = tpu.matmul %55, %57, %cst_54 {dimension_numbers = #tpu.dot_dimension_numbers<[1], [0], [0], [1], [0, 0, 1, 1], [], []>} : vector<2x32xf32>, vector<32x128xf32>, vector<2x128xf32> -> vector<2x128xf32>
    %59 = arith.addf %54, %58 : vector<2x128xf32>
    %c20 = arith.constant 20 : index
    %c0_55 = arith.constant 0 : index
    %60 = vector.load %arg6[%c20, %c0_55] : memref<32x32xf32, #tpu.memory_space<vmem>>, vector<2x32xf32>
    %c10_56 = arith.constant 10 : index
    %c0_57 = arith.constant 0 : index
    %c0_58 = arith.constant 0 : index
    %61 = vector.load %arg3[%c10_56, %c0_57, %c0_58] : memref<16x32x128xf32, #tpu.memory_space<vmem>>, vector<1x32x128xf32>
    %62 = vector.shape_cast %61 : vector<1x32x128xf32> to vector<32x128xf32>
    %cst_59 = arith.constant dense<0.000000e+00> : vector<2x128xf32>
    %63 = tpu.matmul %60, %62, %cst_59 {dimension_numbers = #tpu.dot_dimension_numbers<[1], [0], [0], [1], [0, 0, 1, 1], [], []>} : vector<2x32xf32>, vector<32x128xf32>, vector<2x128xf32> -> vector<2x128xf32>
    %64 = arith.addf %59, %63 : vector<2x128xf32>
    %c22 = arith.constant 22 : index
    %c0_60 = arith.constant 0 : index
    %65 = vector.load %arg6[%c22, %c0_60] : memref<32x32xf32, #tpu.memory_space<vmem>>, vector<2x32xf32>
    %c11 = arith.constant 11 : index
    %c0_61 = arith.constant 0 : index
    %c0_62 = arith.constant 0 : index
    %66 = vector.load %arg3[%c11, %c0_61, %c0_62] : memref<16x32x128xf32, #tpu.memory_space<vmem>>, vector<1x32x128xf32>
    %67 = vector.shape_cast %66 : vector<1x32x128xf32> to vector<32x128xf32>
    %cst_63 = arith.constant dense<0.000000e+00> : vector<2x128xf32>
    %68 = tpu.matmul %65, %67, %cst_63 {dimension_numbers = #tpu.dot_dimension_numbers<[1], [0], [0], [1], [0, 0, 1, 1], [], []>} : vector<2x32xf32>, vector<32x128xf32>, vector<2x128xf32> -> vector<2x128xf32>
    %69 = arith.addf %64, %68 : vector<2x128xf32>
    %c24 = arith.constant 24 : index
    %c0_64 = arith.constant 0 : index
    %70 = vector.load %arg6[%c24, %c0_64] : memref<32x32xf32, #tpu.memory_space<vmem>>, vector<2x32xf32>
    %c12_65 = arith.constant 12 : index
    %c0_66 = arith.constant 0 : index
    %c0_67 = arith.constant 0 : index
    %71 = vector.load %arg3[%c12_65, %c0_66, %c0_67] : memref<16x32x128xf32, #tpu.memory_space<vmem>>, vector<1x32x128xf32>
    %72 = vector.shape_cast %71 : vector<1x32x128xf32> to vector<32x128xf32>
    %cst_68 = arith.constant dense<0.000000e+00> : vector<2x128xf32>
    %73 = tpu.matmul %70, %72, %cst_68 {dimension_numbers = #tpu.dot_dimension_numbers<[1], [0], [0], [1], [0, 0, 1, 1], [], []>} : vector<2x32xf32>, vector<32x128xf32>, vector<2x128xf32> -> vector<2x128xf32>
    %74 = arith.addf %69, %73 : vector<2x128xf32>
    %c26 = arith.constant 26 : index
    %c0_69 = arith.constant 0 : index
    %75 = vector.load %arg6[%c26, %c0_69] : memref<32x32xf32, #tpu.memory_space<vmem>>, vector<2x32xf32>
    %c13 = arith.constant 13 : index
    %c0_70 = arith.constant 0 : index
    %c0_71 = arith.constant 0 : index
    %76 = vector.load %arg3[%c13, %c0_70, %c0_71] : memref<16x32x128xf32, #tpu.memory_space<vmem>>, vector<1x32x128xf32>
    %77 = vector.shape_cast %76 : vector<1x32x128xf32> to vector<32x128xf32>
    %cst_72 = arith.constant dense<0.000000e+00> : vector<2x128xf32>
    %78 = tpu.matmul %75, %77, %cst_72 {dimension_numbers = #tpu.dot_dimension_numbers<[1], [0], [0], [1], [0, 0, 1, 1], [], []>} : vector<2x32xf32>, vector<32x128xf32>, vector<2x128xf32> -> vector<2x128xf32>
    %79 = arith.addf %74, %78 : vector<2x128xf32>
    %c28 = arith.constant 28 : index
    %c0_73 = arith.constant 0 : index
    %80 = vector.load %arg6[%c28, %c0_73] : memref<32x32xf32, #tpu.memory_space<vmem>>, vector<2x32xf32>
    %c14_74 = arith.constant 14 : index
    %c0_75 = arith.constant 0 : index
    %c0_76 = arith.constant 0 : index
    %81 = vector.load %arg3[%c14_74, %c0_75, %c0_76] : memref<16x32x128xf32, #tpu.memory_space<vmem>>, vector<1x32x128xf32>
    %82 = vector.shape_cast %81 : vector<1x32x128xf32> to vector<32x128xf32>
    %cst_77 = arith.constant dense<0.000000e+00> : vector<2x128xf32>
    %83 = tpu.matmul %80, %82, %cst_77 {dimension_numbers = #tpu.dot_dimension_numbers<[1], [0], [0], [1], [0, 0, 1, 1], [], []>} : vector<2x32xf32>, vector<32x128xf32>, vector<2x128xf32> -> vector<2x128xf32>
    %84 = arith.addf %79, %83 : vector<2x128xf32>
    %c30 = arith.constant 30 : index
    %c0_78 = arith.constant 0 : index
    %85 = vector.load %arg6[%c30, %c0_78] : memref<32x32xf32, #tpu.memory_space<vmem>>, vector<2x32xf32>
    %c15 = arith.constant 15 : index
    %c0_79 = arith.constant 0 : index
    %c0_80 = arith.constant 0 : index
    %86 = vector.load %arg3[%c15, %c0_79, %c0_80] : memref<16x32x128xf32, #tpu.memory_space<vmem>>, vector<1x32x128xf32>
    %87 = vector.shape_cast %86 : vector<1x32x128xf32> to vector<32x128xf32>
    %cst_81 = arith.constant dense<0.000000e+00> : vector<2x128xf32>
    %88 = tpu.matmul %85, %87, %cst_81 {dimension_numbers = #tpu.dot_dimension_numbers<[1], [0], [0], [1], [0, 0, 1, 1], [], []>} : vector<2x32xf32>, vector<32x128xf32>, vector<2x128xf32> -> vector<2x128xf32>
    %89 = arith.addf %84, %88 : vector<2x128xf32>
    %c0_82 = arith.constant 0 : index
    %c0_83 = arith.constant 0 : index
    %90 = vector.load %arg4[%c0_82, %c0_83] : memref<1x128xf32, #tpu.memory_space<vmem>>, vector<1x128xf32>
    %91 = vector.broadcast %90 : vector<1x128xf32> to vector<2x128xf32>
    %92 = arith.addf %89, %91 : vector<2x128xf32>
    %c0_84 = arith.constant 0 : index
    %c0_85 = arith.constant 0 : index
    %93 = vector.load %arg5[%c0_84, %c0_85] : memref<2x128xf32, #tpu.memory_space<vmem>>, vector<2x128xf32>
    tpu.vector_store %arg5[%c0_84, %c0_85], %92 {strides = array<i32>} : memref<2x128xf32, #tpu.memory_space<vmem>>, vector<2x128xf32>,
    return
  }
}

</mosaic_0001>

<bundles_post_ra>
// kernel: custom_model_apply.1
= control target key start
LH: loop header
LB: loop body
LE: loop exit
PB: predicated region body
PF: predicated region fallthrough
CT: control target
= control target key end

     0   :  { %vm39_vm0 = vcmask 523264   ;;  %v1923_v21 = vmov 0.0|0.0   ;;  %vm1924_vm1 = vmmov 0   ;;  %v1925_v29 = vmov 0.0   ;;  %s2281_s1 = inlined_call_operand.vmem [shape: f32[64,32], index: 1, kind: input, shape index: {}]   ;;  %s2282_s0 = inlined_call_operand.vmem [shape: f32[32,64], index: 0, kind: input, shape index: {}]   ;;  %s2283_s3 = inlined_call_operand.vmem [shape: f32[16,32,128], index: 3, kind: input, shape index: {}]   ;;  %s2284_s2 = inlined_call_operand.vmem [shape: f32[1,32], index: 2, kind: input, shape index: {}]   ;;  %s2285_s4 = inlined_call_operand.vmem [shape: f32[1,128], index: 4, kind: input, shape index: {}]   ;;  %s2286_s5 = inlined_call_operand.vmem [shape: f32[2,128], index: 5, kind: output, shape index: {}]  }
   0x1   :  { %v24_v0 = vld [vmem:[%s2281_s1] sm:$0xff]  ;;  %v25_v1 = vld [vmem:[%s2281_s1 + $0x8] sm:$0xff]  ;;  %v26_v2 = vld [vmem:[%s2281_s1 + $0x10] sm:$0xff]  ;;  %1824 = vmatprep.subr.bf16.mxu1 %v1923_v21  ;;  %1640 = vmatprep.mubr.msk.f32.mxu1 %vm1924_vm1, %v1925_v29  ;;  %vm141_vm2 = vcmask 261120  }
   0x2   :  { %v1808_v3 = vpack.c.bf16 %v25_v1, %v24_v0  ;;  %v27_v4 = vld [vmem:[%s2281_s1 + $0x18] sm:$0xff]  ;;  %v28_v6 = vld [vmem:[%s2281_s1 + $0x20] sm:$0xff]  ;;  %v29_v7 = vld [vmem:[%s2281_s1 + $0x28] sm:$0xff] }
   0x3   :  { %v1812_v5 = vpack.c.bf16 %v27_v4, %v26_v2  ;;  %v20_v8 = vld [vmem:[%s2282_s0] sm:$0xff]  ;;  %v1816_v9 = vpack.c.bf16 %v29_v7, %v28_v6  ;;  %v30_v10 = vld [vmem:[%s2281_s1 + $0x30] sm:$0xff]  ;;  %v31_v11 = vld [vmem:[%s2281_s1 + $0x38] sm:$0xff] }
   0x4   :  { %1809 = vmatprep.subr.bf16.mxu0 %v1808_v3  ;;  %1626 = vmatprep.mubr.msk.f32.mxu0 %vm39_vm0, %v20_v8  ;;  %v1820_v12 = vpack.c.bf16 %v31_v11, %v30_v10  ;;  %v21_v13 = vld [vmem:[%s2282_s0 + $0x8] sm:$0xff]  ;;  %v22_v14 = vld [vmem:[%s2282_s0 + $0x10] sm:$0xff]  ;;  %v23_v15 = vld [vmem:[%s2282_s0 + $0x18] sm:$0xff] }
   0x5   :  { %1811 = vmatpush3.bf16.msra.mxu0 %v1808_v3  ;;  %v1441_v16 = vld [vmem:[%s2283_s3 + $0x20] sm:$0xff]  ;;  %v1442_v17 = vld [vmem:[%s2283_s3 + $0x28] sm:$0xff]  ;;  %v1443_v23 = vld [vmem:[%s2283_s3 + $0x30] sm:$0xff] }
   0x6   :  { %1813 = vmatprep.subr.bf16.mxu0 %v1812_v5  ;;  %v1447_v18 = vld [vmem:[%s2283_s3 + $0x40] sm:$0xff]  ;;  %v1825_v19 = vpack.c.bf16 %v1442_v17, %v1441_v16  ;;  %v1448_v20 = vld [vmem:[%s2283_s3 + $0x48] sm:$0xff]  ;;  %v1444_v24 = vld [vmem:[%s2283_s3 + $0x38] sm:$0xff] }
   0x7   :  { %v1837_v22 = vpack.c.bf16 %v1448_v20, %v1447_v18  ;;  %v1449_v25 = vld [vmem:[%s2283_s3 + $0x50] sm:$0xff]  ;;  %v1828_v26 = vpack.c.bf16 %v1444_v24, %v1443_v23  ;;  %v1450_v27 = vld [vmem:[%s2283_s3 + $0x58] sm:$0xff]  ;;  %v1436_v30 = vld [vmem:[%s2284_s2] ss:$0 sm:$0xff] }
   0x8   :  { %1826 = vmatpush3.bf16.msra.mxu1 %v1825_v19  ;;  %v1840_v28 = vpack.c.bf16 %v1450_v27, %v1449_v25  ;;  %v147_v41 = vld [vmem:[%s2283_s3] sm:$0xff]  ;;  %v148_v43 = vld [vmem:[%s2283_s3 + $0x8] sm:$0xff]  ;;  %v149_v49 = vld [vmem:[%s2283_s3 + $0x10] sm:$0xff] }
   0x9   :  { %1815 = vmatpush3.bf16.msra.mxu0 %v1812_v5  ;;  %1827 = vmatprep.subr.bf16.mxu1 %v1923_v21  ;;  %v1457_v44 = vld [vmem:[%s2283_s3 + $0x80] sm:$0xff]  ;;  %v1458_v45 = vld [vmem:[%s2283_s3 + $0x88] sm:$0xff]  ;;  %v1831_v47 = vpack.c.bf16 %v148_v43, %v147_v41  ;;  %v150_v50 = vld [vmem:[%s2283_s3 + $0x18] sm:$0xff] }
   0xa   :  { %1817 = vmatprep.subr.bf16.mxu0 %v1816_v9  ;;  %v1849_v48 = vpack.c.bf16 %v1458_v45, %v1457_v44  ;;  %v1459_v51 = vld [vmem:[%s2283_s3 + $0x90] sm:$0xff]  ;;  %v1460_v52 = vld [vmem:[%s2283_s3 + $0x98] sm:$0xff]  ;;  %v1834_v55 = vpack.c.bf16 %v150_v50, %v149_v49  ;;  %v1452_v57 = vld [vmem:[%s2283_s3 + $0x60] sm:$0xff] }
   0xb   :  { %v1852_v56 = vpack.c.bf16 %v1460_v52, %v1459_v51  ;;  %v1453_v58 = vld [vmem:[%s2283_s3 + $0x68] sm:$0xff]  ;;  %v1467_v59 = vld [vmem:[%s2283_s3 + $0xc0] sm:$0xff]  ;;  %v1454_v63 = vld [vmem:[%s2283_s3 + $0x70] sm:$0xff] }
   0xc   :  { %1829 = vmatpush3.bf16.msra.mxu1 %v1828_v26  ;;  %v1468_v60 = vld [vmem:[%s2283_s3 + $0xc8] sm:$0xff]  ;;  %v1843_v61 = vpack.c.bf16 %v1453_v58, %v1452_v57  ;;  %v1455_v0 = vld [vmem:[%s2283_s3 + $0x78] sm:$0xff]  ;;  %v1469_v1 = vld [vmem:[%s2283_s3 + $0xd0] sm:$0xff] }
   0xd   :  { %1819 = vmatpush3.bf16.msra.mxu0 %v1816_v9  ;;  %1830 = vmatprep.subr.bf16.mxu1 %v1923_v21  ;;  %v1861_v62 = vpack.c.bf16 %v1468_v60, %v1467_v59  ;;  %v1470_v2 = vld [vmem:[%s2283_s3 + $0xd8] sm:$0xff]  ;;  %v1846_v5 = vpack.c.bf16 %v1455_v0, %v1454_v63  ;;  %v1462_v7 = vld [vmem:[%s2283_s3 + $0xa0] sm:$0xff]  ;;  %v1463_v8 = vld [vmem:[%s2283_s3 + $0xa8] sm:$0xff] }
   0xe   :  { %1821 = vmatprep.subr.bf16.mxu0 %v1820_v12  ;;  %v1864_v6 = vpack.c.bf16 %v1470_v2, %v1469_v1  ;;  %v1477_v9 = vld [vmem:[%s2283_s3 + $0x100] sm:$0xff]  ;;  %v1478_v10 = vld [vmem:[%s2283_s3 + $0x108] sm:$0xff]  ;;  %v1855_v11 = vpack.c.bf16 %v1463_v8, %v1462_v7  ;;  %v1480_v16 = vld [vmem:[%s2283_s3 + $0x118] sm:$0xff] }
   0xf   :  { %v1473_v23 = vld [vmem:[%s2283_s3 + $0xe8] sm:$0xff]  ;;  %v1487_v24 = vld [vmem:[%s2283_s3 + $0x140] sm:$0xff]  ;;  %v1484_v44 = vld [vmem:[%s2283_s3 + $0x130] sm:$0xff] }
  0x10   :  { %v1488_v25 = vld [vmem:[%s2283_s3 + $0x148] sm:$0xff]  ;;  %v1485_v45 = vld [vmem:[%s2283_s3 + $0x138] sm:$0xff]  ;;  %v1492_v51 = vld [vmem:[%s2283_s3 + $0x160] sm:$0xff] }
  0x11   :  { %1823 = vmatpush3.bf16.msra.mxu0 %v1820_v12  ;;  %v1873_v12 = vpack.c.bf16 %v1478_v10, %v1477_v9  ;;  %v1882_v49 = vpack.c.bf16 %v1485_v45, %v1484_v44  ;;  %v1493_v52 = vld [vmem:[%s2283_s3 + $0x168] sm:$0xff]  ;;  %v1494_v57 = vld [vmem:[%s2283_s3 + $0x170] sm:$0xff]  ;;  %v1495_v58 = vld [vmem:[%s2283_s3 + $0x178] sm:$0xff] }
  0x12   :  { %1836 = vmatprep.subr.bf16.mxu0 %v1923_v21  ;;  %v1509_v59 = vld [vmem:[%s2283_s3 + $0x1d0] sm:$0xff]  ;;  %v1510_v60 = vld [vmem:[%s2283_s3 + $0x1d8] sm:$0xff]  ;;  %v1894_v63 = vpack.c.bf16 %v1495_v58, %v1494_v57  ;;  %v1502_v1 = vld [vmem:[%s2283_s3 + $0x1a0] sm:$0xff] }
  0x13   :  { %v1912_v0 = vpack.c.bf16 %v1510_v60, %v1509_v59  ;;  %v1503_v2 = vld [vmem:[%s2283_s3 + $0x1a8] sm:$0xff]  ;;  %v1512_v9 = vld [vmem:[%s2283_s3 + $0x1e0] sm:$0xff] }
  0x14   :  { %1627 = vmatmul.mubr.msk.f32.vlgmr.msra.gmra.mrb[0].mxu0 %vm39_vm0, %v21_v13  ;;  %v1464_v13 = vld [vmem:[%s2283_s3 + $0xb0] sm:$0xff]  ;;  %v1513_v10 = vld [vmem:[%s2283_s3 + $0x1e8] sm:$0xff] }
  0x15   :  { %1629 = vmatprep.mubr.msk.f32.mxu0 %vm39_vm0, %v22_v14  ;;  %1838 = vmatpush3.bf16.msra.mxu0 %v1837_v22  ;;  %v1465_v14 = vld [vmem:[%s2283_s3 + $0xb8] sm:$0xff]  ;;  %v1472_v22 = vld [vmem:[%s2283_s3 + $0xe0] sm:$0xff] }
  0x16   :  { %1839 = vmatprep.subr.bf16.mxu0 %v1923_v21  ;;  %v1858_v19 = vpack.c.bf16 %v1465_v14, %v1464_v13  ;;  %v1867_v26 = vpack.c.bf16 %v1473_v23, %v1472_v22  ;;  %v1515_v13 = vld [vmem:[%s2283_s3 + $0x1f8] sm:$0xff] }
  0x18   :  { %1630 = vmatmul.mubr.msk.f32.gmra.mrb[2].mxu0 %vm39_vm0, %v23_v15  ;;  %v1479_v15 = vld [vmem:[%s2283_s3 + $0x110] sm:$0xff] }
  0x19   :  { %1662 = vmatprep.mubr.msk.f32.mxu0 %vm1924_vm1, %v1925_v29  ;;  %1841 = vmatpush3.bf16.msra.mxu0 %v1840_v28  ;;  %v1876_v20 = vpack.c.bf16 %v1480_v16, %v1479_v15  ;;  %v1885_v28 = vpack.c.bf16 %v1488_v25, %v1487_v24 }
  0x1a   :  { %1848 = vmatprep.subr.bf16.mxu0 %v1923_v21 }
  0xe7   :  { %v1628_v31 = vpop.f32.mrb[0].mxu0 }
  0xe8   :  { %v124_v32 = vadd.f32 %v1628_v31, %v1436_v30  ;;  %v118_v33 = vpop.f32.mrb[1].mxu0  ;;  %v1475_v31 = vld [vmem:[%s2283_s3 + $0xf8] sm:$0xff] }
  0xe9   :  { %v119_v34 = vadd.f32 %v1436_v30, %v118_v33  ;;  %v1490_v33 = vld [vmem:[%s2283_s3 + $0x158] sm:$0xff] }
  0xea   :  { %v138_v35 = vmax.f32 %v124_v32, 0.0  ;;  %v1489_v32 = vld [vmem:[%s2283_s3 + $0x150] sm:$0xff] }
  0xeb   :  { %v137_v36 = vmax.f32 %v119_v34, 0.0  ;;  %v1631_v37 = vpop.f32.mrb[2].mxu0 }
  0xec   :  { %143 = vst.msk [vmem:[#allocation2 + $0x8] sm:$0xff] %vm141_vm2, %v138_v35  ;;  %v134_v38 = vadd.f32 %v1631_v37, %v1436_v30  ;;  %v128_v39 = vpop.f32.mrb[3].mxu0  ;;  %v1482_v37 = vld [vmem:[%s2283_s3 + $0x120] sm:$0xff] }
  0xed   :  { %142 = vst.msk [vmem:[#allocation2] sm:$0xff] %vm141_vm2, %v137_v36  ;;  %v129_v40 = vadd.f32 %v1436_v30, %v128_v39  ;;  %v1474_v30 = vld [vmem:[%s2283_s3 + $0xf0] sm:$0xff]  ;;  %v1888_v36 = vpack.c.bf16 %v1490_v33, %v1489_v32  ;;  %v1497_v39 = vld [vmem:[%s2283_s3 + $0x180] sm:$0xff] }
  0xee   :  { %v140_v42 = vmax.f32 %v134_v38, 0.0  ;;  %v1870_v35 = vpack.c.bf16 %v1475_v31, %v1474_v30  ;;  %v1483_v38 = vld [vmem:[%s2283_s3 + $0x128] sm:$0xff] }
  0xef   :  { %v139_v46 = vmax.f32 %v129_v40, 0.0  ;;  %v1498_v40 = vld [vmem:[%s2283_s3 + $0x188] sm:$0xff]  ;;  %v1879_v41 = vpack.c.bf16 %v1483_v38, %v1482_v37 }
  0xf0   :  { %145 = vst.msk [vmem:[#allocation2 + $0x18] sm:$0xff] %vm141_vm2, %v140_v42  ;;  %v1897_v43 = vpack.c.bf16 %v1498_v40, %v1497_v39 }
  0xf1   :  { %144 = vst.msk [vmem:[#allocation2 + $0x10] sm:$0xff] %vm141_vm2, %v139_v46  ;;  %v1499_v46 = vld [vmem:[%s2283_s3 + $0x190] sm:$0xff] }
  0xf3   :  { %v463_v4 = vld [vmem:[#allocation2 + $0x8] sm:$0x3]  ;;  %v623_v18 = vld [vmem:[#allocation2 + $0xc] sm:$0x3]  ;;  %v543_v34 = vld [vmem:[#allocation2 + $0xa] sm:$0x3] }
  0xf4   :  { %v151_v53 = vld [vmem:[#allocation2 + $0x2] sm:$0x3]  ;;  %v303_v54 = vld [vmem:[#allocation2 + $0x4] sm:$0x3]  ;;  %v146_v3 = vld [vmem:[#allocation2] sm:$0x3] }
  0xf5   :  { %1641 = vmatmul.mubr.msk.f32.vlgmr.msra.gmra.mrb[0].mxu1 %vm141_vm2, %v151_v53  ;;  %1663 = vmatmul.mubr.msk.f32.vlgmr.msra.gmra.mrb[4].mxu0 %vm141_vm2, %v303_v54  ;;  %v383_v17 = vld [vmem:[#allocation2 + $0x6] sm:$0x3]  ;;  %v1508_v54 = vld [vmem:[%s2283_s3 + $0x1c8] sm:$0xff] }
  0xf6   :  { %1832 = vmatpush3.bf16.msra.mxu1 %v1831_v47  ;;  %1850 = vmatpush3.bf16.msra.mxu0 %v1849_v48  ;;  %v1500_v47 = vld [vmem:[%s2283_s3 + $0x198] sm:$0xff]  ;;  %v703_v48 = vld [vmem:[#allocation2 + $0xe] sm:$0x3]  ;;  %v1507_v53 = vld [vmem:[%s2283_s3 + $0x1c0] sm:$0xff] }
  0xf7   :  { %1833 = vmatprep.subr.bf16.mxu1 %v1923_v21  ;;  %1851 = vmatprep.subr.bf16.mxu0 %v1923_v21  ;;  %v1900_v50 = vpack.c.bf16 %v1500_v47, %v1499_v46  ;;  %v1263_v7 = vld [vmem:[#allocation2 + $0x1c] sm:$0x3]  ;;  %v1183_v14 = vld [vmem:[#allocation2 + $0x1a] sm:$0x3]  ;;  %v1343_v16 = vld [vmem:[#allocation2 + $0x1e] sm:$0x3] }
  0xf8   :  { %1651 = vmatprep.mubr.msk.f32.mxu1 %vm1924_vm1, %v1925_v29  ;;  %1684 = vmatprep.mubr.msk.f32.mxu0 %vm1924_vm1, %v1925_v29  ;;  %v783_v27 = vld [vmem:[#allocation2 + $0x10] sm:$0x3]  ;;  %v943_v42 = vld [vmem:[#allocation2 + $0x14] sm:$0x3] }
  0xfa   :  { %1835 = vmatpush3.bf16.msra.mxu1 %v1834_v55  ;;  %1853 = vmatpush3.bf16.msra.mxu0 %v1852_v56  ;;  %v1891_v55 = vpack.c.bf16 %v1493_v52, %v1492_v51  ;;  %v1909_v56 = vpack.c.bf16 %v1508_v54, %v1507_v53 }
  0xfb   :  { %1842 = vmatprep.subr.bf16.mxu1 %v1923_v21  ;;  %1860 = vmatprep.subr.bf16.mxu0 %v1923_v21 }
  0xfd   :  { %1652 = vmatmul.mubr.msk.f32.vlgmr.msra.gmra.mrb[2].mxu1 %vm141_vm2, %v146_v3  ;;  %1685 = vmatmul.mubr.msk.f32.vlgmr.msra.gmra.mrb[6].mxu0 %vm141_vm2, %v463_v4  ;;  %v1903_v3 = vpack.c.bf16 %v1503_v2, %v1502_v1  ;;  %v1504_v4 = vld [vmem:[%s2283_s3 + $0x1b0] sm:$0xff] }
  0xfe   :  { %1844 = vmatpush3.bf16.msra.mxu1 %v1843_v61  ;;  %1862 = vmatpush3.bf16.msra.mxu0 %v1861_v62  ;;  %v863_v61 = vld [vmem:[#allocation2 + $0x12] sm:$0x3]  ;;  %v1103_v62 = vld [vmem:[#allocation2 + $0x18] sm:$0x3] }
  0xff   :  { %1845 = vmatprep.subr.bf16.mxu1 %v1923_v21  ;;  %1863 = vmatprep.subr.bf16.mxu0 %v1923_v21 }
 0x100   :  { %1673 = vmatprep.mubr.msk.f32.mxu1 %vm1924_vm1, %v1925_v29  ;;  %1706 = vmatprep.mubr.msk.f32.mxu0 %vm1924_vm1, %v1925_v29 }
 0x102   :  { %1847 = vmatpush3.bf16.msra.mxu1 %v1846_v5  ;;  %1865 = vmatpush3.bf16.msra.mxu0 %v1864_v6  ;;  %v1505_v5 = vld [vmem:[%s2283_s3 + $0x1b8] sm:$0xff]  ;;  %v1023_v6 = vld [vmem:[#allocation2 + $0x16] sm:$0x3] }
 0x103   :  { %1854 = vmatprep.subr.bf16.mxu1 %v1923_v21  ;;  %1872 = vmatprep.subr.bf16.mxu0 %v1923_v21  ;;  %v1906_v8 = vpack.c.bf16 %v1505_v5, %v1504_v4 }
 0x105   :  { %1674 = vmatmul.mubr.msk.f32.vlgmr.msra.gmra.mrb[4].mxu1 %vm141_vm2, %v383_v17  ;;  %1707 = vmatmul.mubr.msk.f32.vlgmr.msra.gmra.mrb[8].mxu0 %vm141_vm2, %v623_v18 }
 0x106   :  { %1856 = vmatpush3.bf16.msra.mxu1 %v1855_v11  ;;  %1874 = vmatpush3.bf16.msra.mxu0 %v1873_v12  ;;  %v1915_v11 = vpack.c.bf16 %v1513_v10, %v1512_v9  ;;  %v1514_v12 = vld [vmem:[%s2283_s3 + $0x1f0] sm:$0xff] }
 0x107   :  { %1857 = vmatprep.subr.bf16.mxu1 %v1923_v21  ;;  %1875 = vmatprep.subr.bf16.mxu0 %v1923_v21  ;;  %v1918_v15 = vpack.c.bf16 %v1515_v13, %v1514_v12 }
 0x108   :  { %1695 = vmatprep.mubr.msk.f32.mxu1 %vm1924_vm1, %v1925_v29  ;;  %1728 = vmatprep.mubr.msk.f32.mxu0 %vm1924_vm1, %v1925_v29 }
 0x10a   :  { %1859 = vmatpush3.bf16.msra.mxu1 %v1858_v19  ;;  %1877 = vmatpush3.bf16.msra.mxu0 %v1876_v20 }
 0x10b   :  { %1866 = vmatprep.subr.bf16.mxu1 %v1923_v21  ;;  %1884 = vmatprep.subr.bf16.mxu0 %v1923_v21 }
 0x10d   :  { %1696 = vmatmul.mubr.msk.f32.vlgmr.msra.gmra.mrb[6].mxu1 %vm141_vm2, %v543_v34  ;;  %1729 = vmatmul.mubr.msk.f32.vlgmr.msra.gmra.mrb[10].mxu0 %vm141_vm2, %v783_v27 }
 0x10e   :  { %1868 = vmatpush3.bf16.msra.mxu1 %v1867_v26  ;;  %1886 = vmatpush3.bf16.msra.mxu0 %v1885_v28 }
 0x10f   :  { %1869 = vmatprep.subr.bf16.mxu1 %v1923_v21  ;;  %1887 = vmatprep.subr.bf16.mxu0 %v1923_v21 }
 0x110   :  { %1717 = vmatprep.mubr.msk.f32.mxu1 %vm1924_vm1, %v1925_v29  ;;  %1750 = vmatprep.mubr.msk.f32.mxu0 %vm1924_vm1, %v1925_v29 }
 0x112   :  { %1871 = vmatpush3.bf16.msra.mxu1 %v1870_v35  ;;  %1889 = vmatpush3.bf16.msra.mxu0 %v1888_v36 }
 0x113   :  { %1878 = vmatprep.subr.bf16.mxu1 %v1923_v21  ;;  %1896 = vmatprep.subr.bf16.mxu0 %v1923_v21 }
 0x115   :  { %1718 = vmatmul.mubr.msk.f32.vlgmr.msra.gmra.mrb[8].mxu1 %vm141_vm2, %v703_v48  ;;  %1751 = vmatmul.mubr.msk.f32.vlgmr.msra.gmra.mrb[12].mxu0 %vm141_vm2, %v943_v42 }
 0x116   :  { %1880 = vmatpush3.bf16.msra.mxu1 %v1879_v41  ;;  %1898 = vmatpush3.bf16.msra.mxu0 %v1897_v43 }
 0x117   :  { %1881 = vmatprep.subr.bf16.mxu1 %v1923_v21  ;;  %1899 = vmatprep.subr.bf16.mxu0 %v1923_v21 }
 0x118   :  { %1739 = vmatprep.mubr.msk.f32.mxu1 %vm1924_vm1, %v1925_v29  ;;  %1772 = vmatprep.mubr.msk.f32.mxu0 %vm1924_vm1, %v1925_v29 }
 0x11a   :  { %1883 = vmatpush3.bf16.msra.mxu1 %v1882_v49  ;;  %1901 = vmatpush3.bf16.msra.mxu0 %v1900_v50 }
 0x11b   :  { %1890 = vmatprep.subr.bf16.mxu1 %v1923_v21  ;;  %1908 = vmatprep.subr.bf16.mxu0 %v1923_v21 }
 0x11d   :  { %1740 = vmatmul.mubr.msk.f32.vlgmr.msra.gmra.mrb[10].mxu1 %vm141_vm2, %v863_v61  ;;  %1773 = vmatmul.mubr.msk.f32.vlgmr.msra.gmra.mrb[14].mxu0 %vm141_vm2, %v1103_v62  ;;  %v1517_v62 = vld [vmem:[%s2285_s4] ss:$0 sm:$0xff] }
 0x11e   :  { %1892 = vmatpush3.bf16.msra.mxu1 %v1891_v55  ;;  %1910 = vmatpush3.bf16.msra.mxu0 %v1909_v56 }
 0x11f   :  { %1893 = vmatprep.subr.bf16.mxu1 %v1923_v21  ;;  %1911 = vmatprep.subr.bf16.mxu0 %v1923_v21 }
 0x120   :  { %1761 = vmatprep.mubr.msk.f32.mxu1 %vm1924_vm1, %v1925_v29  ;;  %1794 = vmatprep.mubr.msk.f32.mxu0 %vm1924_vm1, %v1925_v29 }
 0x122   :  { %1895 = vmatpush3.bf16.msra.mxu1 %v1894_v63  ;;  %1913 = vmatpush3.bf16.msra.mxu0 %v1912_v0 }
 0x123   :  { %1902 = vmatprep.subr.bf16.mxu1 %v1923_v21 }
 0x125   :  { %1762 = vmatmul.mubr.msk.f32.vlgmr.msra.gmra.mrb[12].mxu1 %vm141_vm2, %v1023_v6  ;;  %1795 = vmatmul.mubr.msk.f32.vlgmr.msra.gmra.mrb[16].mxu0 %vm141_vm2, %v1263_v7 }
 0x126   :  { %1904 = vmatpush3.bf16.msra.mxu1 %v1903_v3  ;;  %1783 = vmatprep.mubr.msk.f32.mxu1 %vm1924_vm1, %v1925_v29 }
 0x127   :  { %1905 = vmatprep.subr.bf16.mxu1 %v1923_v21 }
 0x12a   :  { %1907 = vmatpush3.bf16.msra.mxu1 %v1906_v8 }
 0x12b   :  { %1914 = vmatprep.subr.bf16.mxu1 %v1923_v21 }
 0x12d   :  { %1784 = vmatmul.mubr.msk.f32.vlgmr.msra.gmra.mrb[14].mxu1 %vm141_vm2, %v1183_v14 }
 0x12e   :  { %1916 = vmatpush3.bf16.msra.mxu1 %v1915_v11  ;;  %1805 = vmatprep.mubr.msk.f32.mxu1 %vm1924_vm1, %v1925_v29 }
 0x12f   :  { %1917 = vmatprep.subr.bf16.mxu1 %v1923_v21 }
 0x132   :  { %1919 = vmatpush3.bf16.msra.mxu1 %v1918_v15 }
 0x135   :  { %1806 = vmatmul.mubr.msk.f32.vlgmr.msra.gmra.mrb[16].mxu1 %vm141_vm2, %v1343_v16 }
 0x1c8   :  { %v226_v17 = vpop.f32.mrb[0].mxu1  ;;  %v378_v18 = vpop.f32.mrb[4].mxu0 }
 0x1c9   :  { %v1642_v19 = vpop.f32.mrb[1].mxu1  ;;  %v1664_v20 = vpop.f32.mrb[5].mxu0 }
 0x1d0   :  { %v299_v22 = vpop.f32.mrb[2].mxu1  ;;  %v538_v23 = vpop.f32.mrb[6].mxu0 }
 0x1d1   :  { %v300_v24 = vadd.f32 %v299_v22, %v226_v17  ;;  %v1653_v25 = vpop.f32.mrb[3].mxu1  ;;  %v1686_v26 = vpop.f32.mrb[7].mxu0 }
 0x1d3   :  { %v382_v27 = vadd.f32 %v378_v18, %v300_v24 }
 0x1d8   :  { %v458_v28 = vpop.f32.mrb[4].mxu1  ;;  %v698_v30 = vpop.f32.mrb[8].mxu0 }
 0x1d9   :  { %v462_v31 = vadd.f32 %v458_v28, %v382_v27  ;;  %v1675_v29 = vpop.f32.mrb[5].mxu1  ;;  %v1708_v32 = vpop.f32.mrb[9].mxu0 }
 0x1db   :  { %v542_v21 = vadd.f32 %v538_v23, %v462_v31 }
 0x1e0   :  { %v618_v33 = vpop.f32.mrb[6].mxu1  ;;  %v858_v34 = vpop.f32.mrb[10].mxu0 }
 0x1e1   :  { %v622_v35 = vadd.f32 %v618_v33, %v542_v21  ;;  %v1697_v36 = vpop.f32.mrb[7].mxu1  ;;  %v1730_v37 = vpop.f32.mrb[11].mxu0 }
 0x1e3   :  { %v702_v38 = vadd.f32 %v698_v30, %v622_v35 }
 0x1e8   :  { %v778_v39 = vpop.f32.mrb[8].mxu1  ;;  %v1018_v40 = vpop.f32.mrb[12].mxu0 }
 0x1e9   :  { %v782_v41 = vadd.f32 %v778_v39, %v702_v38  ;;  %v1719_v42 = vpop.f32.mrb[9].mxu1  ;;  %v1752_v43 = vpop.f32.mrb[13].mxu0 }
 0x1eb   :  { %v862_v44 = vadd.f32 %v858_v34, %v782_v41 }
 0x1f0   :  { %v938_v45 = vpop.f32.mrb[10].mxu1  ;;  %v1178_v46 = vpop.f32.mrb[14].mxu0 }
 0x1f1   :  { %v942_v47 = vadd.f32 %v938_v45, %v862_v44  ;;  %v1741_v48 = vpop.f32.mrb[11].mxu1  ;;  %v1774_v49 = vpop.f32.mrb[15].mxu0 }
 0x1f3   :  { %v1022_v50 = vadd.f32 %v1018_v40, %v942_v47 }
 0x1f8   :  { %v1098_v51 = vpop.f32.mrb[12].mxu1  ;;  %v1338_v52 = vpop.f32.mrb[16].mxu0 }
 0x1f9   :  { %v1102_v53 = vadd.f32 %v1098_v51, %v1022_v50  ;;  %v1763_v54 = vpop.f32.mrb[13].mxu1  ;;  %v1796_v55 = vpop.f32.mrb[17].mxu0 }
 0x1fb   :  { %v1182_v56 = vadd.f32 %v1178_v46, %v1102_v53 }
 0x200   :  { %v1258_v57 = vpop.f32.mrb[14].mxu1 }
 0x201   :  { %v1262_v58 = vadd.f32 %v1258_v57, %v1182_v56  ;;  %v1785_v59 = vpop.f32.mrb[15].mxu1 }
 0x203   :  { %v1342_v60 = vadd.f32 %v1338_v52, %v1262_v58 }
 0x208   :  { %v1418_v61 = vpop.f32.mrb[16].mxu1 }
 0x209   :  { %v1422_v63 = vadd.f32 %v1418_v61, %v1342_v60  ;;  %v1807_v0 = vpop.f32.mrb[17].mxu1 }
 0x20b   :  { %v1430_v1 = vadd.f32 %v1517_v62, %v1422_v63 }
 0x20d   :  { %1431 = vst [vmem:[%s2286_s5] sm:$0x3] %v1430_v1 }

</bundles_post_ra>
